<compile_context>
chip_gen: v7x
topology: tpu7x:2x2x1
jax: 0.10.0
libtpu: 0.0.40
codegen_flags: <defaults>
</compile_context>

<pallas_src>
import functools
import math

import jax
import jax.numpy as jnp
from jax.experimental import pallas as pl
from jax.experimental.pallas import tpu as pltpu


# ------------------------------ tile helpers ----------------------------------

def _pick_tile(dim, target, align):
    """Largest `align`-aligned divisor of `dim` that is <= target; falls back
    to the full dim (block == array dim is always legal)."""
    t = min(target, dim)
    t = (t // align) * align
    while t >= align:
        if dim % t == 0:
            return t
        t -= align
    return dim


# ------------------------------ tiled linear ----------------------------------

def _linear_kernel(x_ref, wt_ref, b_ref, o_ref, acc_ref):
    @pl.when(pl.program_id(2) == 0)
    def _():
        acc_ref[...] = jnp.zeros_like(acc_ref)

    acc_ref[...] += jnp.dot(x_ref[...], wt_ref[...],
                            preferred_element_type=jnp.float32)

    @pl.when(pl.program_id(2) == pl.num_programs(2) - 1)
    def _():
        o_ref[...] = (acc_ref[...] + b_ref[...]).astype(o_ref.dtype)


def linear(x, wt, b, *, tm=512, tn=512, tk=512):
    """y = x @ wt + b, with wt already stored as (in, out) (nn.Linear y=xW^T+b)."""
    M, K = x.shape
    N = wt.shape[1]
    tm = _pick_tile(M, tm, 8)
    tn = _pick_tile(N, tn, 128)
    tk = _pick_tile(K, tk, 128)
    grid = (M // tm, N // tn, K // tk)
    return pl.pallas_call(
        _linear_kernel,
        out_shape=jax.ShapeDtypeStruct((M, N), x.dtype),
        grid=grid,
        in_specs=[pl.BlockSpec((tm, tk), lambda i, j, k: (i, k)),
                  pl.BlockSpec((tk, tn), lambda i, j, k: (k, j)),
                  pl.BlockSpec((1, tn), lambda i, j, k: (0, j))],
        out_specs=pl.BlockSpec((tm, tn), lambda i, j, k: (i, j)),
        scratch_shapes=[pltpu.VMEM((tm, tn), jnp.float32)],
        compiler_params=pltpu.CompilerParams(
            dimension_semantics=("parallel", "parallel", "arbitrary"),
            vmem_limit_bytes=32 * 1024 * 1024),
    )(x, wt, b.reshape(1, N))


# ---------------------------- attention kernels --------------------------------

def _attn_kernel(q_ref, k_ref, v_ref, o_ref, *, scale):
    # q: (tr, d) rows of one head; k/v: (Skv, d) of the head's group.
    q = q_ref[0, 0] * scale                      # fold 1/sqrt(d) into small q
    k = k_ref[0, 0]
    v = v_ref[0, 0]
    s = jax.lax.dot_general(q, k, (((1,), (1,)), ((), ())),
                            preferred_element_type=jnp.float32)   # (tr, Skv) f32
    s = s - jnp.max(s, axis=-1, keepdims=True)
    p = jnp.exp(s)
    denom = jnp.sum(p, axis=-1, keepdims=True)
    og = jax.lax.dot_general(p.astype(v.dtype), v, (((1,), (0,)), ((), ())),
                             preferred_element_type=jnp.float32)  # (tr, d) f32
    # Normalize AFTER the PV matmul (cost ~ d per row instead of ~ Skv).
    o_ref[0, 0] = (og * pl.reciprocal(denom)).astype(o_ref.dtype)


def _attn_kernel_masked(q_ref, k_ref, v_ref, m_ref, o_ref, *, scale):
    q = q_ref[0, 0] * scale
    k = k_ref[0, 0]
    v = v_ref[0, 0]
    s = jax.lax.dot_general(q, k, (((1,), (1,)), ((), ())),
                            preferred_element_type=jnp.float32)
    s = s + m_ref[0, 0].astype(jnp.float32)      # (bs, bskv) broadcasts in-vreg
    s = s - jnp.max(s, axis=-1, keepdims=True)
    p = jnp.exp(s)
    denom = jnp.sum(p, axis=-1, keepdims=True)
    og = jax.lax.dot_general(p.astype(v.dtype), v, (((1,), (0,)), ((), ())),
                             preferred_element_type=jnp.float32)
    o_ref[0, 0] = (og * pl.reciprocal(denom)).astype(o_ref.dtype)


def _attention(Qp, Kp, Vp, attn_mask, *, num_heads, num_groups):
    """Grouped attention: Qp (B,S,E), Kp/Vp (B,Skv,E//G) -> (B,S,E)."""
    B, S, E = Qp.shape
    H, G = num_heads, num_groups
    hpg = H // G
    d = E // H
    Skv_in, kv_width = Kp.shape[1], Kp.shape[2]
    assert (Skv_in * kv_width) % (G * d) == 0, "k/v projection not viewable"
    Skv = (Skv_in * kv_width) // (G * d)          # PyTorch .view(-1, G, d) semantics
    scale = 1.0 / math.sqrt(d)

    # Layout plumbing in the wrapper (XLA) so the kernel needs no concats.
    Q = Qp.reshape(B, S, H, d).transpose(0, 2, 1, 3).reshape(B, G, hpg * S, d)
    K = Kp.reshape(B, Skv, G, d).transpose(0, 2, 1, 3)        # (B, G, Skv, d)
    V = Vp.reshape(B, Skv, G, d).transpose(0, 2, 1, 3)

    tr = _pick_tile(S, 256, 8)                    # row tile (divides S)
    ntq = S // tr                                 # row tiles per head
    R = hpg * ntq                                 # row tiles per (batch, group)

    q_spec = pl.BlockSpec((1, 1, tr, d), lambda b, g, r: (b, g, r, 0))
    kv_spec = pl.BlockSpec((1, 1, Skv, d), lambda b, g, r: (b, g, 0, 0))
    o_spec = pl.BlockSpec((1, 1, tr, d), lambda b, g, r: (b, g, r, 0))
    out_shape = jax.ShapeDtypeStruct((B, G, hpg * S, d), Qp.dtype)
    cparams = pltpu.CompilerParams(
        dimension_semantics=("parallel", "parallel", "parallel"),
        vmem_limit_bytes=32 * 1024 * 1024)

    if attn_mask is None:
        out = pl.pallas_call(
            functools.partial(_attn_kernel, scale=scale),
            out_shape=out_shape,
            grid=(B, G, R),
            in_specs=[q_spec, kv_spec, kv_spec],
            out_specs=o_spec,
            compiler_params=cparams,
        )(Q, K, V)
    else:
        # Keep the mask at its broadcastable shape; never materialize per-head copies.
        m4 = jnp.asarray(attn_mask)
        m4 = m4.reshape((1,) * (4 - m4.ndim) + m4.shape)
        mb, mh, ms, mskv = m4.shape
        assert mb in (1, B) and mh in (1, H) and ms in (1, S) and mskv in (1, Skv), \
            "unsupported attn_mask broadcast shape"
        bs = tr if ms == S else 1

        def m_map(b, g, r, _mb=mb, _mh=mh, _ms=ms):
            bi = b if _mb == B else 0
            hi = (g * hpg + r // ntq) if _mh == H else 0
            si = (r % ntq) if _ms == S else 0
            return (bi, hi, si, 0)

        m_spec = pl.BlockSpec((1, 1, bs, mskv), m_map)
        out = pl.pallas_call(
            functools.partial(_attn_kernel_masked, scale=scale),
            out_shape=out_shape,
            grid=(B, G, R),
            in_specs=[q_spec, kv_spec, kv_spec, m_spec],
            out_specs=o_spec,
            compiler_params=cparams,
        )(Q, K, V, m4)

    # (B, G, hpg*S, d) -> (B, S, E); head order is g*hpg + h (repeat_interleave).
    out = out.reshape(B, G, hpg, S, d).transpose(0, 3, 1, 2, 4).reshape(B, S, E)
    return out


# ------------------------- Module: params + forward ----------------------------

def init_gqa_params(key, embed_dim, num_heads, num_groups, dtype=jnp.float32):
    """Deterministic init matching the PyTorch module (xavier_uniform_ weights,
    default nn.Linear bias init).  Weights stored PRE-TRANSPOSED as
    (in_features, out_features) so the forward pass never materializes W.T."""
    kd = embed_dim // num_groups
    ks = jax.random.split(key, 8)

    def xavier_t(k, out_f, in_f):
        a = math.sqrt(6.0 / (in_f + out_f))
        w = jax.random.uniform(k, (out_f, in_f), dtype, -a, a)
        return w.T                                  # store as (in, out)

    def bias(k, in_f, out_f):
        bound = 1.0 / math.sqrt(in_f)
        return jax.random.uniform(k, (out_f,), dtype, -bound, bound)

    return {
        "q_wt": xavier_t(ks[0], embed_dim, embed_dim), "q_b": bias(ks[1], embed_dim, embed_dim),
        "k_wt": xavier_t(ks[2], kd, embed_dim),        "k_b": bias(ks[3], embed_dim, kd),
        "v_wt": xavier_t(ks[4], kd, embed_dim),        "v_b": bias(ks[5], embed_dim, kd),
        "o_wt": xavier_t(ks[6], embed_dim, embed_dim), "o_b": bias(ks[7], embed_dim, embed_dim),
    }


def grouped_query_attention(params, query, key, value, attn_mask=None, *,
                            num_heads, num_groups):
    B, S, E = query.shape
    H, G = num_heads, num_groups
    assert H % G == 0 and E % H == 0
    Skv = key.shape[1]

    # Projections (tiled Pallas matmuls).
    Q = linear(query.reshape(B * S, E), params["q_wt"], params["q_b"]).reshape(B, S, E)
    K = linear(key.reshape(B * Skv, E), params["k_wt"], params["k_b"]).reshape(B, Skv, E // G)
    V = linear(value.reshape(B * Skv, E), params["v_wt"], params["v_b"]).reshape(B, Skv, E // G)

    # Grouped attention (head split / group sharing handled via grid + BlockSpecs).
    attn_out = _attention(Q, K, V, attn_mask, num_heads=H, num_groups=G)

    out = linear(attn_out.reshape(B * S, E), params["o_wt"], params["o_b"]).reshape(B, S, E)
    return out


# ---------------------------------- reference -----------------------------------

def _reference(params, query, key, value, attn_mask, num_heads, num_groups):
    B, S, E = query.shape
    H, G = num_heads, num_groups
    hpg, d = H // G, E // H
    Q = query @ params["q_wt"] + params["q_b"]
    K = key @ params["k_wt"] + params["k_b"]
    V = value @ params["v_wt"] + params["v_b"]
    Q = Q.reshape(B, S, H, d).transpose(0, 2, 1, 3)
    K = jnp.repeat(K.reshape(B, -1, G, d).transpose(0, 2, 1, 3), hpg, axis=1)
    V = jnp.repeat(V.reshape(B, -1, G, d).transpose(0, 2, 1, 3), hpg, axis=1)
    s = jnp.einsum("bhqd,bhkd->bhqk", Q, K) / math.sqrt(d)
    if attn_mask is not None:
        s = s + attn_mask
    p = jax.nn.softmax(s, axis=-1)
    o = jnp.einsum("bhqk,bhkd->bhqd", p, V).transpose(0, 2, 1, 3).reshape(B, S, E)
    return o @ params["o_wt"] + params["o_b"]


# ------------------------------------ main ---------------------------------------

if __name__ == "__main__":
    def run_case(embed_dim, num_heads, num_groups, B, S, mask_kind, seed):
        root = jax.random.PRNGKey(seed)
        kp, kq, kk, kv = jax.random.split(root, 4)
        params = init_gqa_params(kp, embed_dim, num_heads, num_groups)
        query = jax.random.normal(kq, (B, S, embed_dim), jnp.float32)
        key_t = jax.random.normal(kk, (B, S, embed_dim), jnp.float32)
        value = jax.random.normal(kv, (B, S, embed_dim), jnp.float32)
        mask = None
        if mask_kind is not None:
            causal = jnp.tril(jnp.ones((S, S), dtype=bool))
            m = jnp.where(causal, 0.0, -1e9).astype(jnp.float32)
            if mask_kind == "broadcast":
                mask = m.reshape(1, 1, S, S)
            else:  # per-head mask (exercises the per-head BlockSpec index_map)
                mask = jnp.broadcast_to(m.reshape(1, 1, S, S), (1, num_heads, S, S))
        out = grouped_query_attention(params, query, key_t, value, attn_mask=mask,
                                      num_heads=num_heads, num_groups=num_groups)
        out = jax.block_until_ready(out)
        ref = _reference(params, query, key_t, value, mask, num_heads, num_groups)
        assert out.shape == (B, S, embed_dim)
        assert jnp.allclose(out, ref, rtol=1e-4, atol=2e-4), (
            f"mismatch vs reference (E={embed_dim}, H={num_heads}, G={num_groups}, "
            f"B={B}, S={S}, mask={mask_kind})")

    # Toy shapes matching the module's small configuration (H == G**2 -> Skv_eff == S).
    run_case(embed_dim=32, num_heads=4, num_groups=2, B=2, S=8, mask_kind=None, seed=0)
    run_case(embed_dim=32, num_heads=4, num_groups=2, B=2, S=8, mask_kind="broadcast", seed=1)
    # Moderate shape where H != G**2 -> the PyTorch view makes Skv_eff = 2*S.
    run_case(embed_dim=256, num_heads=8, num_groups=2, B=2, S=256, mask_kind=None, seed=2)
    # Moderate shape with a per-head mask (H == G**2 so a (S,S) mask is valid).
    run_case(embed_dim=256, num_heads=16, num_groups=4, B=2, S=128, mask_kind="per_head", seed=3)

    print("KERNEL_OK")
</pallas_src>

<mosaic_0001>
module attributes {stable_mosaic.version = 11 : i64} {
  func.func @_linear_kernel(%arg0: i32, %arg1: i32, %arg2: i32, %arg3: memref<16x32xf32, #tpu.memory_space<vmem>>, %arg4: memref<32x32xf32, #tpu.memory_space<vmem>>, %arg5: memref<1x32xf32, #tpu.memory_space<vmem>>, %arg6: memref<16x32xf32, #tpu.memory_space<vmem>>, %arg7: memref<16x32xf32, #tpu.memory_space<vmem>>) attributes {dimension_semantics = [#tpu.dimension_semantics<parallel>, #tpu.dimension_semantics<parallel>, #tpu.dimension_semantics<arbitrary>], iteration_bounds = array<i64: 1, 1, 1>, scalar_prefetch = 0 : i64, scratch_operands = 1 : i64, tpu.core_type = #tpu.core_type<tc>, window_params = [{transform_indices = @transform_0, window_bounds = array<i64: 16, 32>}, {transform_indices = @transform_1, window_bounds = array<i64: 32, 32>}, {transform_indices = @transform_2, window_bounds = array<i64: 1, 32>}, {transform_indices = @transform_3, window_bounds = array<i64: 16, 32>}]} {
    %c0_i32 = arith.constant 0 : i32
    %0 = arith.cmpi eq, %arg2, %c0_i32 : i32
    %1 = arith.extui %0 : i1 to i32
    %c0_i32_0 = arith.constant 0 : i32
    %2 = arith.cmpi ne, %1, %c0_i32_0 : i32
    scf.if %2 {
      %cst_10 = arith.constant 0.000000e+00 : f32
      %12 = vector.broadcast %cst_10 : f32 to vector<16x32xf32>
      %c0_11 = arith.constant 0 : index
      %c0_12 = arith.constant 0 : index
      %13 = vector.load %arg7[%c0_11, %c0_12] : memref<16x32xf32, #tpu.memory_space<vmem>>, vector<16x32xf32>
      tpu.vector_store %arg7[%c0_11, %c0_12], %12 {strides = array<i32>} : memref<16x32xf32, #tpu.memory_space<vmem>>, vector<16x32xf32>,
    } else {
    }
    %c0 = arith.constant 0 : index
    %c0_1 = arith.constant 0 : index
    %3 = vector.load %arg7[%c0, %c0_1] : memref<16x32xf32, #tpu.memory_space<vmem>>, vector<16x32xf32>
    %c0_2 = arith.constant 0 : index
    %c0_3 = arith.constant 0 : index
    %4 = vector.load %arg3[%c0_2, %c0_3] : memref<16x32xf32, #tpu.memory_space<vmem>>, vector<16x32xf32>
    %c0_4 = arith.constant 0 : index
    %c0_5 = arith.constant 0 : index
    %5 = vector.load %arg4[%c0_4, %c0_5] : memref<32x32xf32, #tpu.memory_space<vmem>>, vector<32x32xf32>
    %cst = arith.constant dense<0.000000e+00> : vector<16x32xf32>
    %6 = tpu.matmul %4, %5, %cst {dimension_numbers = #tpu.dot_dimension_numbers<[1], [0], [0], [1], [0, 0, 1, 1], [], []>} : vector<16x32xf32>, vector<32x32xf32>, vector<16x32xf32> -> vector<16x32xf32>
    %7 = arith.addf %3, %6 : vector<16x32xf32>
    %c0_6 = arith.constant 0 : index
    %c0_7 = arith.constant 0 : index
    %8 = vector.load %arg7[%c0_6, %c0_7] : memref<16x32xf32, #tpu.memory_space<vmem>>, vector<16x32xf32>
    tpu.vector_store %arg7[%c0_6, %c0_7], %7 {strides = array<i32>} : memref<16x32xf32, #tpu.memory_space<vmem>>, vector<16x32xf32>,
    %c0_i32_8 = arith.constant 0 : i32
    %9 = arith.cmpi eq, %arg2, %c0_i32_8 : i32
    %10 = arith.extui %9 : i1 to i32
    %c0_i32_9 = arith.constant 0 : i32
    %11 = arith.cmpi ne, %10, %c0_i32_9 : i32
    scf.if %11 {
      %c0_10 = arith.constant 0 : index
      %c0_11 = arith.constant 0 : index
      %12 = vector.load %arg7[%c0_10, %c0_11] : memref<16x32xf32, #tpu.memory_space<vmem>>, vector<16x32xf32>
      %c0_12 = arith.constant 0 : index
      %c0_13 = arith.constant 0 : index
      %13 = vector.load %arg5[%c0_12, %c0_13] : memref<1x32xf32, #tpu.memory_space<vmem>>, vector<1x32xf32>
      %14 = vector.broadcast %13 : vector<1x32xf32> to vector<16x32xf32>
      %15 = arith.addf %12, %14 : vector<16x32xf32>
      %c0_14 = arith.constant 0 : index
      %c0_15 = arith.constant 0 : index
      %16 = vector.load %arg6[%c0_14, %c0_15] : memref<16x32xf32, #tpu.memory_space<vmem>>, vector<16x32xf32>
      tpu.vector_store %arg6[%c0_14, %c0_15], %15 {strides = array<i32>} : memref<16x32xf32, #tpu.memory_space<vmem>>, vector<16x32xf32>,
    } else {
    }
    return
  }
  func.func @transform_0(%arg0: i32, %arg1: i32, %arg2: i32) -> (i32, i32) {
    %c0_i32 = arith.constant 0 : i32
    return %arg0, %arg2 : i32, i32
  }
  func.func @transform_1(%arg0: i32, %arg1: i32, %arg2: i32) -> (i32, i32) {
    %c0_i32 = arith.constant 0 : i32
    return %arg2, %arg1 : i32, i32
  }
  func.func @transform_2(%arg0: i32, %arg1: i32, %arg2: i32) -> (i32, i32) {
    %c0_i32 = arith.constant 0 : i32
    %c0_i32_0 = arith.constant 0 : i32
    return %c0_i32, %arg1 : i32, i32
  }
  func.func @transform_3(%arg0: i32, %arg1: i32, %arg2: i32) -> (i32, i32) {
    %c0_i32 = arith.constant 0 : i32
    return %arg0, %arg1 : i32, i32
  }
}

</mosaic_0001>

<bundles_post_ra>
// kernel: tpu_custom_call.1
= control target key start
LH: loop header
LB: loop body
LE: loop exit
PB: predicated region body
PF: predicated region fallthrough
CT: control target
= control target key end

     0   :  { %8 = vsyncpa [#allocation4], 0  ;;  %s366_s0 = inlined_call_operand.hbm [shape: f32[16,32], index: 0, kind: input, shape index: {}]   ;;  %s367_s1 = inlined_call_operand.hbm [shape: f32[32,32], index: 1, kind: input, shape index: {}]   ;;  %s368_s2 = inlined_call_operand.vmem [shape: f32[1,32], index: 2, kind: input, shape index: {}]   ;;  %s369_s3 = inlined_call_operand.hbm [shape: f32[16,32], index: 3, kind: output, shape index: {}]  }
   0x1   :  { %9 = vsyncpa [#allocation7], 0 }
   0x2   :  { %10 = vsyncpa [#allocation5], 0  ;;  %s284_s12 = smov [#allocation3]   ;;  %s212_s16 = scalar_lea.hbm %s366_s0, 256 }
   0x3   :  { %s16_s13 = sshll.u32 %s284_s12, 4  ;;  %p213_p0 = scmp.ne.s32.totalorder %s366_s0, %s212_s16  ;;  %s17_s13 = int_to_ptr.vmem [resolvable:$true] %s16_s13 }
   0x4   :  { %p216_p1 = scmp.lt.u32.totalorder %s212_s16, %s366_s0 }
   0x6   :  { %p218_p2 = pnand %p216_p1, %p213_p0 }
   0x8   :  { %221 = shalt.err (!%p218_p2)
}
   0x9   :  { %s222_s21 = scalar_lea.vmem %s17_s13, 256  ;;  %p227_p4 = scmp.lt.s32.totalorder %s17_s13, %s17_s13 }
   0xa   :  { %p223_p3 = scmp.ne.s32.totalorder %s17_s13, %s222_s21  ;;  %p228_p5 = scmp.lt.s32.totalorder %s222_s21, %s222_s21 }
   0xc   :  { %p229_p6 = por %p228_p5, %p227_p4 }
   0xe   :  { %p230_p7 = pnand %p229_p6, %p223_p3 }
  0x10   :  { %233 = shalt.err (!%p230_p7)
}
  0x11   :  { %s285_s22 = smov 128   ;;  %s286_s23 = smov 8  }
  0x12   :  { %22 = dma.hbm_to_vmem [thread:$0]  %s366_s0, 256, %s17_s13, [#allocation4], %s285_s22, %s285_s22, %s286_s23  }
  0x13   :  { %s287_s26 = smov [#allocation6]   ;;  %s234_s30 = scalar_lea.hbm %s367_s1, 512 }
  0x14   :  { %s28_s27 = sshll.u32 %s287_s26, 4  ;;  %p235_p8 = scmp.ne.s32.totalorder %s367_s1, %s234_s30  ;;  %s29_s27 = int_to_ptr.vmem [resolvable:$true] %s28_s27 }
  0x15   :  { %p238_p9 = scmp.lt.u32.totalorder %s234_s30, %s367_s1 }
  0x17   :  { %p240_p10 = pnand %p238_p9, %p235_p8 }
  0x19   :  { %243 = shalt.err (!%p240_p10)
}
  0x1a   :  { %s244_s8 = scalar_lea.vmem %s29_s27, 512  ;;  %p249_p12 = scmp.lt.s32.totalorder %s29_s27, %s29_s27 }
  0x1b   :  { %p245_p11 = scmp.ne.s32.totalorder %s29_s27, %s244_s8  ;;  %p250_p13 = scmp.lt.s32.totalorder %s244_s8, %s244_s8 }
  0x1d   :  { %p251_p0 = por %p250_p13, %p249_p12 }
  0x1f   :  { %p252_p1 = pnand %p251_p0, %p245_p11 }
  0x21   :  { %255 = shalt.err (!%p252_p1)
}
  0x22   :  { %34 = dma.hbm_to_vmem [thread:$0]  %s367_s1, 512, %s29_s27, [#allocation7], %s285_s22, %s285_s22, %s286_s23  }
  0x23   :  { %278 = dma.done.wait [#allocation4], 256  }
  0x24   :  { %279 = vsyncadd [#allocation4], 4294967040 }
  0x25   :  { %280 = dma.done.wait [#allocation7], 512  }
  0x26   :  { %281 = vsyncadd [#allocation7], 4294966784  ;;  %vm47_vm0 = vcmask 261120   ;;  %v288_v0 = vmov 0.0   ;;  %v54_v1 = vld [vmem:[#allocation6] sm:$0xff]  ;;  %v55_v2 = vld [vmem:[#allocation6 + $0x8] sm:$0xff] }
  0x27   :  { %49 = vst.msk [vmem:[#allocation2 + $0x8] sm:$0xff] %vm47_vm0, %v288_v0  ;;  %48 = vst.msk [vmem:[#allocation2] sm:$0xff] %vm47_vm0, %v288_v0  ;;  %v56_v3 = vld [vmem:[#allocation6 + $0x10] sm:$0xff]  ;;  %v198_v4 = vpack.c.bf16 %v55_v2, %v54_v1  ;;  %v57_v5 = vld [vmem:[#allocation6 + $0x18] sm:$0xff]  ;;  %s289_s11 = smov [#allocation8]  }
  0x28   :  { %v52_v6 = vld [vmem:[#allocation3] sm:$0xff]  ;;  %v202_v7 = vpack.c.bf16 %v57_v5, %v56_v3  ;;  %v53_v8 = vld [vmem:[#allocation3 + $0x8] sm:$0xff]  ;;  %v180_v15 = vld [vmem:[%s368_s2] ss:$0 sm:$0xff]  ;;  %s165_s12 = sshll.u32 %s289_s11, 4  ;;  %s166_s12 = int_to_ptr.vmem [resolvable:$true] %s165_s12 }
  0x29   :  { %195 = vmatprep.mubr.msk.f32.mxu0 %vm47_vm0, %v52_v6  ;;  %199 = vmatprep.subr.bf16.mxu0 %v198_v4  ;;  %s256_s13 = scalar_lea.vmem %s166_s12, 256  ;;  %p261_p3 = scmp.lt.s32.totalorder %s166_s12, %s166_s12 }
  0x2a   :  { %201 = vmatpush3.bf16.msra.mxu0 %v198_v4  ;;  %p257_p2 = scmp.ne.s32.totalorder %s166_s12, %s256_s13  ;;  %p262_p4 = scmp.lt.s32.totalorder %s256_s13, %s256_s13 }
  0x2b   :  { %203 = vmatprep.subr.bf16.mxu0 %v202_v7 }
  0x2c   :  { %p263_p5 = por %p262_p4, %p261_p3 }
  0x2e   :  { %205 = vmatpush3.bf16.msra.mxu0 %v202_v7  ;;  %v51_v9 = vld [vmem:[#allocation2 + $0x8] sm:$0xff]  ;;  %v50_v10 = vld [vmem:[#allocation2] sm:$0xff]  ;;  %p264_p6 = pnand %p263_p5, %p257_p2 }
  0x31   :  { %196 = vmatmul.mubr.msk.f32.vlgmr.msra.gmra.mrb[0].mxu0 %vm47_vm0, %v53_v8 }
 0x104   :  { %v197_v11 = vpop.f32.mrb[0].mxu0 }
 0x105   :  { %v141_v12 = vadd.f32 %v197_v11, %v51_v9  ;;  %v131_v13 = vpop.f32.mrb[1].mxu0 }
 0x106   :  { %v140_v14 = vadd.f32 %v131_v13, %v50_v10 }
 0x107   :  { %143 = vst.msk [vmem:[#allocation2 + $0x8] sm:$0xff] %vm47_vm0, %v141_v12 }
 0x108   :  { %142 = vst.msk [vmem:[#allocation2] sm:$0xff] %vm47_vm0, %v140_v14 }
 0x10e   :  { %v148_v16 = vld [vmem:[#allocation2 + $0x8] sm:$0xff] }
 0x10f   :  { %v147_v17 = vld [vmem:[#allocation2] sm:$0xff]  ;;  %v157_v18 = vadd.f32 %v180_v15, %v148_v16 }
 0x110   :  { %v156_v19 = vadd.f32 %v180_v15, %v147_v17 }
 0x111   :  { %159 = vst.msk [vmem:[#allocation8 + $0x8] sm:$0xff] %vm47_vm0, %v157_v18 }
 0x112   :  { %158 = vst.msk [vmem:[#allocation8] sm:$0xff] %vm47_vm0, %v156_v19 }
 0x113   :  { %267 = shalt.err (!%p264_p6)
}
 0x114   :  { %s268_s15 = scalar_lea.hbm %s369_s3, 256 }
 0x115   :  { %p269_p7 = scmp.ne.s32.totalorder %s369_s3, %s268_s15  ;;  %p272_p8 = scmp.lt.u32.totalorder %s268_s15, %s369_s3 }
 0x117   :  { %p274_p9 = pnand %p272_p8, %p269_p7 }
 0x119   :  { %277 = shalt.err (!%p274_p9)
}
 0x11a   :  { %171 = dma.vmem_to_hbm [thread:$0]  %s166_s12, 256, %s369_s3, [#allocation5], %s285_s22, %s285_s22, %s286_s23  }
 0x11b   :  { %282 = dma.done.wait [#allocation5], 256  }
 0x11c   :  { %283 = vsyncadd [#allocation5], 4294967040 }
 0x11d   :  { %175 = vsyncpa [#allocation4], 1 }
 0x11e   :  { %176 = vsyncpa [#allocation7], 1 }
 0x11f   :  { %177 = vsyncpa [#allocation5], 1 }

</bundles_post_ra>
